<compile_context>
chip_gen: v5e
topology: v5e:2x2
jax: 0.10.0
libtpu: 0.0.40
codegen_flags: <defaults>
</compile_context>

<pallas_src>
import functools
import math

import jax
import jax.numpy as jnp
from jax.experimental import pallas as pl
from jax.experimental.pallas import tpu as pltpu


# ----------------------------------------------------------------------------
# Parameter construction (matches torchaudio.functional.melscale_fbanks with
# norm=None, mel_scale='htk', and torch.hann_window(periodic=True)).
# ----------------------------------------------------------------------------
def _hz_to_mel_htk(hz):
    return 2595.0 * jnp.log10(1.0 + hz / 700.0)


def _mel_to_hz_htk(mel):
    return 700.0 * (jnp.power(10.0, mel / 2595.0) - 1.0)


def melscale_fbanks_htk(n_freqs, f_min, f_max, n_mels, sample_rate):
    all_freqs = jnp.linspace(0.0, sample_rate // 2, n_freqs, dtype=jnp.float32)
    m_min = _hz_to_mel_htk(jnp.asarray(f_min, jnp.float32))
    m_max = _hz_to_mel_htk(jnp.asarray(f_max, jnp.float32))
    m_pts = jnp.linspace(m_min, m_max, n_mels + 2, dtype=jnp.float32)
    f_pts = _mel_to_hz_htk(m_pts)
    f_diff = f_pts[1:] - f_pts[:-1]                       # (n_mels + 1,)
    slopes = f_pts[None, :] - all_freqs[:, None]          # (n_freqs, n_mels + 2)
    down = -slopes[:, :-2] / f_diff[:-1]
    up = slopes[:, 2:] / f_diff[1:]
    fb = jnp.maximum(0.0, jnp.minimum(down, up))
    return fb.astype(jnp.float32)                         # (n_freqs, n_mels)


def hann_window_periodic(n):
    k = jnp.arange(n, dtype=jnp.float32)
    return 0.5 - 0.5 * jnp.cos(2.0 * math.pi * k / n)


def dft_basis(n_fft, window):
    """Real/imag DFT bases pre-multiplied by the analysis window.

    Returns cos_mat, sin_mat of shape (n_fft, n_freqs), n_freqs = n_fft//2 + 1,
    so  stft_real = frames @ cos_mat,  stft_imag = frames @ sin_mat.
    """
    n_freqs = n_fft // 2 + 1
    n = jnp.arange(n_fft, dtype=jnp.float32)[:, None]
    k = jnp.arange(n_freqs, dtype=jnp.float32)[None, :]
    ang = 2.0 * math.pi * n * k / n_fft
    cos_mat = (window[:, None] * jnp.cos(ang)).astype(jnp.float32)
    sin_mat = (-window[:, None] * jnp.sin(ang)).astype(jnp.float32)
    return cos_mat, sin_mat


def _round_up(x, m):
    return (x + m - 1) // m * m


# ----------------------------------------------------------------------------
# Pallas kernel: fused windowed DFT -> |.|^2 -> mel projection -> log
# ----------------------------------------------------------------------------
def _logmel_kernel(frames_ref, basis_ref, fb_ref, out_ref, *, n_freqs_p):
    fr = frames_ref[...]                                            # (TR, n_fft)
    # Single MXU pass over the frames tile: basis = [cos | sin] (lane-aligned
    # halves, n_freqs_p is a multiple of 128 so the re/im slices don't repack).
    spec = jnp.dot(fr, basis_ref[...],
                   preferred_element_type=jnp.float32)              # (TR, 2*n_freq_p)
    re = spec[:, :n_freqs_p]
    im = spec[:, n_freqs_p:]
    power = re * re + im * im                                       # |stft|^2 (power=2.0)
    mel = jnp.dot(power, fb_ref[...],
                  preferred_element_type=jnp.float32)               # (TR, n_mel_p) f32
    out_ref[...] = jnp.log(mel + 1e-6)


def _choose_row_tile(rows, requested):
    """Multiple of 8, capped so the grid has >= 2 steps (v7x: 2 TensorCores)."""
    cap = max(8, _round_up(-(-rows // 2), 8))
    return max(8, min(_round_up(requested, 8), cap))


def _logmel_pallas(frames, basis_p, fb_p, *, n_mels, row_tile):
    """frames: (rows, n_fft) compute_dtype.  Returns (rows, n_mels) f32."""
    rows, n_fft = frames.shape
    two_n_freqs_p = basis_p.shape[1]
    n_freqs_p = two_n_freqs_p // 2
    n_mels_p = fb_p.shape[1]

    row_tile = _choose_row_tile(rows, row_tile)
    grid = (pl.cdiv(rows, row_tile),)            # ragged last block is fine:
    kernel = functools.partial(_logmel_kernel, n_freqs_p=n_freqs_p)

    out_p = pl.pallas_call(
        kernel,
        out_shape=jax.ShapeDtypeStruct((rows, n_mels_p), jnp.float32),
        grid_spec=pltpu.PrefetchScalarGridSpec(
            num_scalar_prefetch=0,
            grid=grid,
            in_specs=[
                # last dim = full array dim (400), legal without 128 padding
                pl.BlockSpec((row_tile, n_fft), lambda i: (i, 0)),
                pl.BlockSpec((n_fft, two_n_freqs_p), lambda i: (0, 0)),
                pl.BlockSpec((n_freqs_p, n_mels_p), lambda i: (0, 0)),
            ],
            out_specs=pl.BlockSpec((row_tile, n_mels_p), lambda i: (i, 0)),
        ),
        compiler_params=pltpu.CompilerParams(
            dimension_semantics=("parallel",),
        ),
    )(frames, basis_p, fb_p)

    return out_p[:, :n_mels]


# ----------------------------------------------------------------------------
# Gather-free framing: ceil(n_fft/hop) static slices + reshapes.
#   frames[b, t, c*hop + j] = x_pad[b, t*hop + c*hop + j]
# The compute-dtype cast is fused here so frames are materialized once,
# already in compute_dtype.
# ----------------------------------------------------------------------------
def _frame_signal(x_pad, n_frames, n_fft, hop, dtype):
    batch, length_p = x_pad.shape
    x_pad = x_pad.astype(dtype)
    n_chunks = -(-n_fft // hop)                       # ceil(n_fft / hop)
    need = (n_chunks - 1) * hop + n_frames * hop
    if need > length_p:
        # Extra zeros are only read in positions trimmed away below.
        x_pad = jnp.pad(x_pad, ((0, 0), (0, need - length_p)))
    cols = []
    for c in range(n_chunks):
        width = min(hop, n_fft - c * hop)
        chunk = x_pad[:, c * hop: c * hop + n_frames * hop]
        chunk = chunk.reshape(batch, n_frames, hop)[..., :width]
        cols.append(chunk)
    return jnp.concatenate(cols, axis=-1)             # (batch, n_frames, n_fft)


def _logmel_forward(x, *, basis_p, fb_p, n_fft, hop_length, n_mels,
                    row_tile, compute_dtype):
    x = x.astype(jnp.float32)
    batch, length = x.shape
    pad = n_fft // 2
    # center=True, pad_mode='reflect' (same as torch.stft)
    x_pad = jnp.pad(x, ((0, 0), (pad, pad)), mode="reflect")
    n_frames = 1 + length // hop_length
    frames = _frame_signal(x_pad, n_frames, n_fft, hop_length, compute_dtype)
    frames = frames.reshape(batch * n_frames, n_fft)   # view, no copy

    logmel = _logmel_pallas(frames, basis_p, fb_p, n_mels=n_mels,
                            row_tile=row_tile)
    logmel = logmel.reshape(batch, n_frames, n_mels)
    return jnp.transpose(logmel, (0, 2, 1))            # (batch, n_mels, n_frames)


# ----------------------------------------------------------------------------
# Module-equivalent wrapper
# ----------------------------------------------------------------------------
class LogMelFilterBanksPallas:
    def __init__(self, n_fft=400, samplerate=16000, hop_length=160, n_mels=80,
                 f_min_hz=0.0, row_tile=1024, compute_dtype=jnp.bfloat16):
        # compute_dtype controls the dtype of the frames/DFT-basis MXU inputs.
        # bf16 (default): single-pass MXU matmuls with f32 accumulation; the
        # power/mel/log epilogue and the mel projection stay f32.
        # Pass compute_dtype=jnp.float32 for bit-closer-to-torch numerics.
        self.n_fft = n_fft
        self.samplerate = samplerate
        self.hop_length = hop_length
        self.n_mels = n_mels
        self.n_freqs = n_fft // 2 + 1
        self.f_min_hz = f_min_hz
        self.f_max_hz = samplerate // 2               # module forces f_max = sr // 2
        self.compute_dtype = compute_dtype

        # ---- constants, padded/fused ONCE here (hoisted out of __call__) ----
        n_freqs_p = _round_up(self.n_freqs, 128)
        n_mels_p = _round_up(n_mels, 128)

        window = hann_window_periodic(n_fft)
        cos_mat, sin_mat = dft_basis(n_fft, window)
        # Fused [cos | sin] basis; K dim kept at n_fft (no 400 -> 512 pad).
        basis = jnp.zeros((n_fft, 2 * n_freqs_p), jnp.float32)
        basis = basis.at[:, :self.n_freqs].set(cos_mat)
        basis = basis.at[:, n_freqs_p:n_freqs_p + self.n_freqs].set(sin_mat)

        fb = melscale_fbanks_htk(
            n_freqs=self.n_freqs, f_min=self.f_min_hz, f_max=self.f_max_hz,
            n_mels=self.n_mels, sample_rate=self.samplerate)
        fb_p = jnp.zeros((n_freqs_p, n_mels_p), jnp.float32)
        fb_p = fb_p.at[:self.n_freqs, :self.n_mels].set(fb)

        self.window = window
        self.mel_fbanks = fb
        self.basis_p = basis.astype(compute_dtype)
        self.fb_p = fb_p                              # keep f32 (cheap, precise)

        self._forward = jax.jit(functools.partial(
            _logmel_forward, basis_p=self.basis_p, fb_p=self.fb_p,
            n_fft=n_fft, hop_length=hop_length, n_mels=n_mels,
            row_tile=row_tile, compute_dtype=compute_dtype))

    def __call__(self, x):
        """x: (batch, time) f32  ->  (batch, n_mels, n_frames) f32."""
        return self._forward(x)


# ----------------------------------------------------------------------------
# Pure-JAX reference (gather framing + HIGHEST-precision matmuls)
# ----------------------------------------------------------------------------
def _reference_logmel(x, module):
    x = x.astype(jnp.float32)
    pad = module.n_fft // 2
    x_pad = jnp.pad(x, ((0, 0), (pad, pad)), mode="reflect")
    n_frames = 1 + x.shape[1] // module.hop_length
    starts = jnp.arange(n_frames) * module.hop_length
    idx = starts[:, None] + jnp.arange(module.n_fft)[None, :]
    frames = x_pad[:, idx]                                       # (B, T, n_fft)
    cos_mat, sin_mat = dft_basis(module.n_fft, module.window)
    hi = jax.lax.Precision.HIGHEST
    re = jnp.einsum("btn,nf->btf", frames, cos_mat, precision=hi)
    im = jnp.einsum("btn,nf->btf", frames, sin_mat, precision=hi)
    power = re * re + im * im
    mel = jnp.einsum("btf,fm->btm", power, module.mel_fbanks, precision=hi)
    return jnp.transpose(jnp.log(mel + 1e-6), (0, 2, 1))


if __name__ == "__main__":
    key = jax.random.PRNGKey(0)
    batch, time = 2, 1600                      # 0.1 s of 16 kHz audio
    x = jax.random.normal(key, (batch, time), dtype=jnp.float32)

    # Default (bf16 matmul inputs, per perf review) and an f32 variant for a
    # tighter numeric check.
    mod = LogMelFilterBanksPallas(n_fft=400, samplerate=16000,
                                  hop_length=160, n_mels=80)
    mod_f32 = LogMelFilterBanksPallas(n_fft=400, samplerate=16000,
                                      hop_length=160, n_mels=80,
                                      compute_dtype=jnp.float32)

    out = jax.block_until_ready(mod(x))
    out_f32 = jax.block_until_ready(mod_f32(x))

    expected_frames = 1 + time // mod.hop_length
    assert out.shape == (batch, mod.n_mels, expected_frames), out.shape
    assert out.dtype == jnp.float32
    assert bool(jnp.all(jnp.isfinite(out)))
    assert out_f32.shape == out.shape

    ref = jax.block_until_ready(_reference_logmel(x, mod_f32))
    # f32 kernel: tight-ish check; bf16 kernel: looser log-domain tolerance.
    assert bool(jnp.allclose(out_f32, ref, rtol=5e-2, atol=1e-1)), (
        float(jnp.max(jnp.abs(out_f32 - ref))))
    assert bool(jnp.allclose(out, ref, rtol=1e-1, atol=2e-1)), (
        float(jnp.max(jnp.abs(out - ref))))

    print("KERNEL_OK")
</pallas_src>

<mosaic_0001>
module attributes {stable_mosaic.version = 11 : i64} {
  func.func @_logmel_kernel(%arg0: i32, %arg1: memref<16x400xbf16, #tpu.memory_space<vmem>>, %arg2: memref<400x512xbf16, #tpu.memory_space<vmem>>, %arg3: memref<256x128xf32, #tpu.memory_space<vmem>>, %arg4: memref<16x128xf32, #tpu.memory_space<vmem>>) attributes {dimension_semantics = [#tpu.dimension_semantics<parallel>], iteration_bounds = array<i64: 2>, scalar_prefetch = 0 : i64, scratch_operands = 0 : i64, tpu.core_type = #tpu.core_type<tc>, window_params = [{transform_indices = @transform_0, window_bounds = array<i64: 16, 400>}, {pipeline_mode = #tpu.pipeline_mode<synchronous>, transform_indices = @transform_1, window_bounds = array<i64: 400, 512>}, {pipeline_mode = #tpu.pipeline_mode<synchronous>, transform_indices = @transform_2, window_bounds = array<i64: 256, 128>}, {transform_indices = @transform_3, window_bounds = array<i64: 16, 128>}]} {
    %c0 = arith.constant 0 : index
    %c0_0 = arith.constant 0 : index
    %0 = vector.load %arg1[%c0, %c0_0] : memref<16x400xbf16, #tpu.memory_space<vmem>>, vector<16x400xbf16>
    %c0_1 = arith.constant 0 : index
    %c0_2 = arith.constant 0 : index
    %1 = vector.load %arg2[%c0_1, %c0_2] : memref<400x512xbf16, #tpu.memory_space<vmem>>, vector<400x512xbf16>
    %cst = arith.constant dense<0.000000e+00> : vector<16x512xf32>
    %2 = tpu.matmul %0, %1, %cst {dimension_numbers = #tpu.dot_dimension_numbers<[1], [0], [0], [1], [0, 0, 1, 1], [], []>} : vector<16x400xbf16>, vector<400x512xbf16>, vector<16x512xf32> -> vector<16x512xf32>
    %3 = vector.extract_strided_slice %2 {offsets = [0, 0], sizes = [16, 256], strides = [1, 1]} : vector<16x512xf32> to vector<16x256xf32>
    %4 = vector.extract_strided_slice %2 {offsets = [0, 256], sizes = [16, 256], strides = [1, 1]} : vector<16x512xf32> to vector<16x256xf32>
    %5 = arith.mulf %3, %3 : vector<16x256xf32>
    %6 = arith.mulf %4, %4 : vector<16x256xf32>
    %7 = arith.addf %5, %6 : vector<16x256xf32>
    %c0_3 = arith.constant 0 : index
    %c0_4 = arith.constant 0 : index
    %8 = vector.load %arg3[%c0_3, %c0_4] : memref<256x128xf32, #tpu.memory_space<vmem>>, vector<256x128xf32>
    %cst_5 = arith.constant dense<0.000000e+00> : vector<16x128xf32>
    %9 = tpu.matmul %7, %8, %cst_5 {dimension_numbers = #tpu.dot_dimension_numbers<[1], [0], [0], [1], [0, 0, 1, 1], [], []>} : vector<16x256xf32>, vector<256x128xf32>, vector<16x128xf32> -> vector<16x128xf32>
    %cst_6 = arith.constant 9.99999997E-7 : f32
    %10 = vector.broadcast %cst_6 : f32 to vector<16x128xf32>
    %11 = arith.addf %9, %10 : vector<16x128xf32>
    %12 = math.log %11 : vector<16x128xf32>
    %c0_7 = arith.constant 0 : index
    %c0_8 = arith.constant 0 : index
    %13 = vector.load %arg4[%c0_7, %c0_8] : memref<16x128xf32, #tpu.memory_space<vmem>>, vector<16x128xf32>
    tpu.vector_store %arg4[%c0_7, %c0_8], %12 {strides = array<i32>} : memref<16x128xf32, #tpu.memory_space<vmem>>, vector<16x128xf32>,
    return
  }
  func.func @transform_0(%arg0: i32) -> (i32, i32) {
    %c0_i32 = arith.constant 0 : i32
    %c0_i32_0 = arith.constant 0 : i32
    return %arg0, %c0_i32 : i32, i32
  }
  func.func @transform_1(%arg0: i32) -> (i32, i32) {
    %c0_i32 = arith.constant 0 : i32
    %c0_i32_0 = arith.constant 0 : i32
    %c0_i32_1 = arith.constant 0 : i32
    return %c0_i32, %c0_i32_0 : i32, i32
  }
  func.func @transform_2(%arg0: i32) -> (i32, i32) {
    %c0_i32 = arith.constant 0 : i32
    %c0_i32_0 = arith.constant 0 : i32
    %c0_i32_1 = arith.constant 0 : i32
    return %c0_i32, %c0_i32_0 : i32, i32
  }
  func.func @transform_3(%arg0: i32) -> (i32, i32) {
    %c0_i32 = arith.constant 0 : i32
    %c0_i32_0 = arith.constant 0 : i32
    return %arg0, %c0_i32 : i32, i32
  }
}

</mosaic_0001>

<bundles_post_ra>
// kernel: reverse.1
= control target key start
LH: loop header
LB: loop body
LE: loop exit
PB: predicated region body
PF: predicated region fallthrough
CT: control target
= control target key end

     0   :  { %v2_v0 = vlaneseq  ;;  %s305_s0 = inlined_call_operand.vmem [shape: bf16[2,256], index: 0, kind: input, shape index: {}]   ;;  %s306_s1 = inlined_call_operand.vmem [shape: bf16[2,256], index: 1, kind: output, shape index: {}]  }
   0x2   :  { %v3_v1 = vsub.s32 127, %v2_v0 }
   0x4   :  { %4 = vset.pattern.permute.xlu0 %v3_v1 }
   0x5   :  { %s265_s6 = smov 0   ;;  %s267_s7 = smov 0  }
   0x6   :  { %s269_s8 = smov 0  }
   0x7 LB: > { %s201_s9 = sadd.s32 4294967295, %s253_s8   ;;  %s19_s10 = sadd.s32 1, %s249_s7  ;;  %s253_s8 = sphi %s269_s8, %s10_s8   ;;  %s249_s7 = sphi %s267_s7, %s308_s7   ;;  %s245_s6 = sphi %s265_s6, %s307_s6  }
   0x8   : > { %p20_p0 = scmp.ge.s32.totalorder %s19_s10, 2  ;;  %p203_p1 = scmp.ge.s32.totalorder %s253_s8, 2 }
   0x9   : > { %s38_s11 = sand.u32 (!%p203_p1), 1, %s253_s8   ;;  %s40_s12 = ssub.s32 (!%p203_p1), 1, %s249_s7 }
   0xa   : > { %s310_s10 = smov (%p20_p0, %s19_s10), 0  ;;  %36 = sbr.rel (%p203_p1) target bundleno = 17 (0x11), region = 16 }
   0xb   : > { %s43_s15 = scalar_lea.vmem (!%p203_p1), %s305_s0, %s40_s12  ;;  %s39_s16 = scalar_lea.vmem (!%p203_p1), [#allocation1], %s38_s11 }
   0xf   : > { %v60_v2 = vld [vmem:[%s43_s15] sm:$0x1] }
  0x10   : > { %61 = vst [vmem:[%s39_s16] sm:$0x1] %v60_v2 }
  0x11 PF: > { %p204_p2 = scmp.ge.s32.totalorder %s253_s8, 1  ;;  %p78_p3 = scmp.lt.s32.totalorder %s253_s8, 3 }
  0x13   : > { %p79_p4 = pnand %p204_p2, %p78_p3 }
  0x14   : > { %s88_s17 = sand.u32 (!%p79_p4), 1, %s201_s9   ;;  %s125_s22 = scalar_lea.vmem (!%p79_p4), %s306_s1, %s245_s6 }
  0x15   : > { %82 = sbr.rel (%p79_p4) target bundleno = 171 (0xab), region = 50  ;;  %s89_s18 = scalar_lea.vmem (!%p79_p4), [#allocation1], %s88_s17 }
  0x16   : > { %s92_s19 = scalar_lea.vmem (!%p79_p4), [#allocation3], %s88_s17 }
  0x1a   : > { %v104_v3 = vld [vmem:[%s89_s18] sm:$0x1] }
  0x1b   : > { %v105_v4 = vunpack.c.l.bf16 %v104_v3 }
  0x1d   : > { %107 = vst [vmem:[#allocation0] sm:$0x3] %v105_v4 }
  0x24   : > { %v109_v5 = vld [vmem:[#allocation0] sm:$0xff] }
  0x25   : > { %110 = vperm.xlu0 %4, %v109_v5  }
  0x97   : > { %v111_v6 = vpop.permute.xlu0 %110 }
  0x98   : > { %112 = vst [vmem:[#allocation2] sm:$0xff] %v111_v6 }
  0x9f   : > { %v115_v7 = vld [vmem:[#allocation2] sm:$0x3] }
  0xa0   : > { %v116_v8 = vpack.c.bf16 0.0, %v115_v7 }
  0xa2   : > { %119 = vst [vmem:[%s92_s19] sm:$0x1] %v116_v8 }
  0xa9   : > { %v142_v9 = vld [vmem:[%s92_s19] sm:$0x1] }
  0xaa   : > { %143 = vst [vmem:[%s125_s22] sm:$0x1] %v142_v9 }
  0xab PF: > { %s10_s8 = sadd.s32 1, %s253_s8   ;;  %s307_s6 = smov %s249_s7 }
  0xac   : > { %p7_p5 = scmp.ge.s32.totalorder %s10_s8, 4   ;;  %s308_s7 = smov %s310_s10 }
  0xae   :  { %9 = sbr.rel (!%p7_p5) target bundleno = 7 (0x7), region = 110 }

// kernel: _logmel_forward.1
= control target key start
LH: loop header
LB: loop body
LE: loop exit
PB: predicated region body
PF: predicated region fallthrough
CT: control target
= control target key end

     0   :  { %8 = vsyncpa [#allocation3], 0  ;;  %s2202_s12 = smov 0   ;;  %s2204_s13 = smov 0   ;;  %s2464_s0 = inlined_call_operand.vmem [shape: bf16[22,400], index: 0, kind: input, shape index: {}]   ;;  %s2465_s1 = inlined_call_operand.hbm [shape: bf16[400,512], index: 1, kind: input, shape index: {}]   ;;  %s2466_s2 = inlined_call_operand.vmem [shape: f32[256,128], index: 2, kind: input, shape index: {}]   ;;  %s2467_s3 = inlined_call_operand.vmem [shape: f32[22,128], index: 3, kind: output, shape index: {}]  }
   0x1   :  { %s2206_s14 = smov 0  }
   0x2 LB: > { %s2215_s15 = sadd.s32 4294967295, %s2145_s14   ;;  %s2217_s16 = sadd.s32 1, %s2145_s14   ;;  %s2145_s14 = sphi %s2206_s14, %s2471_s14   ;;  %s2141_s13 = sphi %s2204_s13, %s2470_s13   ;;  %s2137_s12 = sphi %s2202_s12, %s2469_s12  }
   0x3   : > { %s86_s17 = ssub.s32 %s2145_s14, %s2217_s16  ;;  %s89_s18 = sadd.s32 1, %s2141_s13 }
   0x4   : > { %p87_p0 = scmp.eq.s32.totalorder %s86_s17, 0  ;;  %p99_p1 = scmp.ne.s32.totalorder %s2141_s13, %s2137_s12 }
   0x5   : > { %p100_p2 = scmp.eq.s32.totalorder %s2215_s15, 1  ;;  %p1398_p3 = scmp.ge.s32.totalorder %s2145_s14, 1 }
   0x6   : > { %s2225_s19 = scalar_select %p87_p0, %s2141_s13, %s89_s18  }
   0x7   : > { %p2227_p4 = por %p100_p2, %p99_p1  ;;  %p113_p5 = scmp.lt.s32.totalorder %s2145_s14, 3 }
   0x8   : > { %p1960_p6 = scmp.eq.s32.totalorder %s2215_s15, 0  ;;  %s124_s23 = sshll.u32 %s2465_s1, 4  ;;  %s125_s23 = int_to_ptr.hbm [resolvable:$true] %s124_s23 }
   0x9   : > { %p114_p7 = pnand %p1398_p3, %p113_p5  ;;  %s2179_s24 = smov [#allocation2]  }
   0xa   : > { %s126_s25 = sshll.u32 %s2179_s24, 4  ;;  %s2180_s26 = smov 256   ;;  %s127_s25 = int_to_ptr.vmem [resolvable:$true] %s126_s25 }
   0xb   : > { %p1956_p8 = pneg %p114_p7  ;;  %s2181_s27 = smov 16  }
   0xc   : > { %165 = sbr.rel (%p114_p7) target bundleno = 461 (0x1cd), region = 32 }
   0xd   : > { %p1957_p9 = pnand %p1960_p6, %p1956_p8 }
   0xf   : > { %1959 = dma.hbm_to_vmem [thread:$0]  (!%p1957_p9), %s125_s23, 12800, %s127_s25, [#allocation3], %s2180_s26, %s2180_s26, %s2181_s27  }
  0x11   : > { %2132 = dma.done.wait (%p1960_p6), [#allocation3], 12800  }
  0x12   : > { %2134 = vsyncadd (%p1960_p6), [#allocation3], 4294954496  ;;  %s2242_s28 = sshll.u32 %s2215_s15, 1  ;;  %v1537_v0 = vld [vmem:[#allocation2 + $0xe0] sm:$0xf]  ;;  %vm841_vm0 = vcmask 130048  }
  0x13   : > { %v1879_v1 = vld [vmem:[#allocation2 + $0xec] sm:$0xf0]  ;;  %v1665_v2 = vld [vmem:[#allocation2 + $0x1e0] sm:$0xf]  ;;  %v1877_v9 = vld [vmem:[#allocation2 + $0xe4] sm:$0xf] }
  0x14   : > { %v1538_v3 = vor.u32 %v1879_v1, %v1537_v0  ;;  %v1911_v4 = vld [vmem:[#allocation2 + $0x1ec] sm:$0xf0]  ;;  %v1793_v5 = vld [vmem:[#allocation2 + $0x2e0] sm:$0xf]  ;;  %v1539_v10 = vld [vmem:[#allocation2 + $0xf0] sm:$0xf0] }
  0x15   : > { %v1943_v6 = vld [vmem:[#allocation2 + $0x2ec] sm:$0xf0]  ;;  %v1666_v7 = vor.u32 %v1911_v4, %v1665_v2  ;;  %v1521_v11 = vld [vmem:[#allocation2 + $0xc0] sm:$0xf]  ;;  %v1542_v12 = vor.u32 %v1877_v9, %v1539_v10  ;;  %v1873_v20 = vld [vmem:[#allocation2 + $0xc4] sm:$0xf] }
  0x16   : > { %v1794_v8 = vor.u32 %v1943_v6, %v1793_v5  ;;  %845 = vmatpush.bf16.msra.mxu0 %v1538_v3  ;;  %v1875_v13 = vld [vmem:[#allocation2 + $0xcc] sm:$0xf0]  ;;  %v1649_v14 = vld [vmem:[#allocation2 + $0x1c0] sm:$0xf]  ;;  %v1523_v22 = vld [vmem:[#allocation2 + $0xd0] sm:$0xf0] }
  0x17   : > { %v1907_v15 = vld [vmem:[#allocation2 + $0x1cc] sm:$0xf0]  ;;  %859 = vmatpush.bf16.msra.mxu1 %v1666_v7  ;;  %v1522_v16 = vor.u32 %v1875_v13, %v1521_v11  ;;  %v1777_v18 = vld [vmem:[#allocation2 + $0x2c0] sm:$0xf]  ;;  %901 = vmatpush.bf16.msra.mxu3 %v1542_v12  ;;  %v1526_v25 = vor.u32 %v1873_v20, %v1523_v22  ;;  %v1869_v31 = vld [vmem:[#allocation2 + $0xa4] sm:$0xf] }
  0x18   : > { %873 = vmatpush.bf16.msra.mxu2 %v1794_v8  ;;  %v1650_v17 = vor.u32 %v1907_v15, %v1649_v14  ;;  %v1939_v19 = vld [vmem:[#allocation2 + $0x2cc] sm:$0xf0]  ;;  %v1505_v23 = vld [vmem:[#allocation2 + $0xa0] sm:$0xf]  ;;  %v1507_v32 = vld [vmem:[#allocation2 + $0xb0] sm:$0xf0] }
  0x19   : > { %v1778_v21 = vor.u32 %v1939_v19, %v1777_v18  ;;  %v1871_v24 = vld [vmem:[#allocation2 + $0xac] sm:$0xf0]  ;;  %v1633_v26 = vld [vmem:[#allocation2 + $0x1a0] sm:$0xf]  ;;  %v1510_v38 = vor.u32 %v1869_v31, %v1507_v32  ;;  %v1865_v42 = vld [vmem:[#allocation2 + $0x84] sm:$0xf] }
  0x1a   : > { %v1903_v27 = vld [vmem:[#allocation2 + $0x1ac] sm:$0xf0]  ;;  %v1761_v28 = vld [vmem:[#allocation2 + $0x2a0] sm:$0xf]  ;;  %846 = vmatpush.bf16.msra.mxu0 %v1522_v16  ;;  %v1506_v29 = vor.u32 %v1871_v24, %v1505_v23  ;;  %v1491_v43 = vld [vmem:[#allocation2 + $0x90] sm:$0xf0] }
  0x1b   : > { %v1935_v30 = vld [vmem:[#allocation2 + $0x2ac] sm:$0xf0]  ;;  %860 = vmatpush.bf16.msra.mxu1 %v1650_v17  ;;  %v1634_v33 = vor.u32 %v1903_v27, %v1633_v26  ;;  %v1489_v35 = vld [vmem:[#allocation2 + $0x80] sm:$0xf]  ;;  %902 = vmatpush.bf16.msra.mxu3 %v1526_v25  ;;  %p201_p10 = scmp.lt.s32.totalorder %s2242_s28, 2  ;;  %v1494_v50 = vor.u32 %v1865_v42, %v1491_v43  ;;  %s192_s11 = sand.u32 1, %s2137_s12  }
  0x1c   : > { %874 = vmatpush.bf16.msra.mxu2 %v1778_v21  ;;  %v1762_v34 = vor.u32 %v1935_v30, %v1761_v28  ;;  %v1867_v36 = vld [vmem:[#allocation2 + $0x8c] sm:$0xf0]  ;;  %v1617_v37 = vld [vmem:[#allocation2 + $0x180] sm:$0xf]  ;;  %v1861_v54 = vld [vmem:[#allocation2 + $0x64] sm:$0xf] }
  0x1d   : > { %v1899_v39 = vld [vmem:[#allocation2 + $0x18c] sm:$0xf0]  ;;  %v1745_v40 = vld [vmem:[#allocation2 + $0x280] sm:$0xf]  ;;  %v1490_v44 = vor.u32 %v1867_v36, %v1489_v35  ;;  %v1475_v55 = vld [vmem:[#allocation2 + $0x70] sm:$0xf0] }
  0x1e   : > { %v1931_v41 = vld [vmem:[#allocation2 + $0x28c] sm:$0xf0]  ;;  %847 = vmatpush.bf16.msra.mxu0 %v1506_v29  ;;  %v1618_v45 = vor.u32 %v1899_v39, %v1617_v37  ;;  %v1473_v47 = vld [vmem:[#allocation2 + $0x60] sm:$0xf]  ;;  %s2248_s29 = scalar_select %p201_p10, %s2242_s28, 2  ;;  %v1478_v62 = vor.u32 %v1861_v54, %v1475_v55 }
  0x1f   : > { %861 = vmatpush.bf16.msra.mxu1 %v1634_v33  ;;  %v1746_v46 = vor.u32 %v1931_v41, %v1745_v40  ;;  %v1863_v48 = vld [vmem:[#allocation2 + $0x6c] sm:$0xf0]  ;;  %v1601_v49 = vld [vmem:[#allocation2 + $0x160] sm:$0xf]  ;;  %903 = vmatpush.bf16.msra.mxu3 %v1510_v38  ;;  %v1857_v2 = vld [vmem:[#allocation2 + $0x44] sm:$0xf] }
  0x20   : > { %875 = vmatpush.bf16.msra.mxu2 %v1762_v34  ;;  %v1895_v51 = vld [vmem:[#allocation2 + $0x16c] sm:$0xf0]  ;;  %v1729_v52 = vld [vmem:[#allocation2 + $0x260] sm:$0xf]  ;;  %v1474_v56 = vor.u32 %v1863_v48, %v1473_v47  ;;  %v1459_v3 = vld [vmem:[#allocation2 + $0x50] sm:$0xf0] }
  0x21   : > { %v1927_v53 = vld [vmem:[#allocation2 + $0x26c] sm:$0xf0]  ;;  %v1602_v57 = vor.u32 %v1895_v51, %v1601_v49  ;;  %v1457_v59 = vld [vmem:[#allocation2 + $0x40] sm:$0xf]  ;;  %s1844_s30 = sshll.u32 %s2248_s29, 4  ;;  %v1462_v10 = vor.u32 %v1857_v2, %v1459_v3  ;;  %s1403_s14 = sshll.u32 %s192_s11, 4 }
  0x22   : > { %848 = vmatpush.bf16.msra.mxu0 %v1490_v44  ;;  %v1730_v58 = vor.u32 %v1927_v53, %v1729_v52  ;;  %v1859_v60 = vld [vmem:[#allocation2 + $0x4c] sm:$0xf0]  ;;  %v1585_v61 = vld [vmem:[#allocation2 + $0x140] sm:$0xf]  ;;  %v1853_v14 = vld [vmem:[#allocation2 + $0x24] sm:$0xf]  ;;  %s2254_s6 = scalar_lea.vmem %s2464_s0, %s1844_s30 }
  0x23   : > { %862 = vmatpush.bf16.msra.mxu1 %v1618_v45  ;;  %904 = vmatpush.bf16.msra.mxu3 %v1494_v50  ;;  %v1891_v63 = vld [vmem:[#allocation2 + $0x14c] sm:$0xf0]  ;;  %v1713_v0 = vld [vmem:[#allocation2 + $0x240] sm:$0xf]  ;;  %v1458_v4 = vor.u32 %v1859_v60, %v1457_v59  ;;  %v1443_v15 = vld [vmem:[#allocation2 + $0x30] sm:$0xf0] }
  0x24   : > { %876 = vmatpush.bf16.msra.mxu2 %v1746_v46  ;;  %v1923_v1 = vld [vmem:[#allocation2 + $0x24c] sm:$0xf0]  ;;  %v1586_v5 = vor.u32 %v1891_v63, %v1585_v61  ;;  %v1441_v7 = vld [vmem:[#allocation2 + $0x20] sm:$0xf]  ;;  %v1849_v25 = vld [vmem:[#allocation2 + $0x4] sm:$0xf]  ;;  %v1446_v26 = vor.u32 %v1853_v14, %v1443_v15 }
  0x25   : > { %v1714_v6 = vor.u32 %v1923_v1, %v1713_v0  ;;  %v1855_v8 = vld [vmem:[#allocation2 + $0x2c] sm:$0xf0]  ;;  %v1569_v9 = vld [vmem:[#allocation2 + $0x120] sm:$0xf]  ;;  %v1427_v27 = vld [vmem:[#allocation2 + $0x10] sm:$0xf0] }
  0x26   : > { %849 = vmatpush.bf16.msra.mxu0 %v1474_v56  ;;  %v1887_v11 = vld [vmem:[#allocation2 + $0x12c] sm:$0xf0]  ;;  %v1697_v12 = vld [vmem:[#allocation2 + $0x220] sm:$0xf]  ;;  %v1442_v17 = vor.u32 %v1855_v8, %v1441_v7  ;;  %v1909_v28 = vld [vmem:[#allocation2 + $0x1e4] sm:$0xf]  ;;  %v1430_v42 = vor.u32 %v1849_v25, %v1427_v27 }
  0x27   : > { %863 = vmatpush.bf16.msra.mxu1 %v1602_v57  ;;  %905 = vmatpush.bf16.msra.mxu3 %v1478_v62  ;;  %v1919_v13 = vld [vmem:[#allocation2 + $0x22c] sm:$0xf0]  ;;  %v1425_v16 = vld [vmem:[#allocation2] sm:$0xf]  ;;  %v1570_v21 = vor.u32 %v1887_v11, %v1569_v9  ;;  %v1667_v29 = vld [vmem:[#allocation2 + $0x1f0] sm:$0xf0] }
  0x28   : > { %877 = vmatpush.bf16.msra.mxu2 %v1730_v58  ;;  %v1851_v18 = vld [vmem:[#allocation2 + $0xc] sm:$0xf0]  ;;  %v1553_v19 = vld [vmem:[#allocation2 + $0x100] sm:$0xf]  ;;  %v1698_v22 = vor.u32 %v1919_v13, %v1697_v12  ;;  %v1941_v30 = vld [vmem:[#allocation2 + $0x2e4] sm:$0xf]  ;;  %v1670_v43 = vor.u32 %v1909_v28, %v1667_v29 }
  0x29   : > { %v1883_v20 = vld [vmem:[#allocation2 + $0x10c] sm:$0xf0]  ;;  %v1681_v23 = vld [vmem:[#allocation2 + $0x200] sm:$0xf]  ;;  %v1795_v31 = vld [vmem:[#allocation2 + $0x2f0] sm:$0xf0]  ;;  %v1426_v33 = vor.u32 %v1851_v18, %v1425_v16 }
  0x2a   : > { %850 = vmatpush.bf16.msra.mxu0 %v1458_v4  ;;  %v1915_v24 = vld [vmem:[#allocation2 + $0x20c] sm:$0xf0]  ;;  %v1545_v32 = vld [vmem:[#allocation2 + $0xe8] sm:$0xf]  ;;  %v1880_v34 = vld [vmem:[#allocation2 + $0xf4] sm:$0xf0]  ;;  %v1554_v37 = vor.u32 %v1883_v20, %v1553_v19  ;;  %v1798_v47 = vor.u32 %v1941_v30, %v1795_v31 }
  0x2b   : > { %864 = vmatpush.bf16.msra.mxu1 %v1586_v5  ;;  %906 = vmatpush.bf16.msra.mxu3 %v1462_v10  ;;  %v1417_v35 = vld [vmem:[%s2254_s6 + $0x8] sm:$0xf]  ;;  %v1848_v36 = vld [vmem:[%s2254_s6 + $0x14] sm:$0xf0]  ;;  %v1682_v38 = vor.u32 %v1915_v24, %v1681_v23  ;;  %v1905_v39 = vld [vmem:[#allocation2 + $0x1c4] sm:$0xf]  ;;  %v1546_v48 = vor.u32 %v1880_v34, %v1545_v32 }
  0x2c   : > { %878 = vmatpush.bf16.msra.mxu2 %v1714_v6  ;;  %v1409_v40 = vld [vmem:[%s2254_s6] sm:$0xf]  ;;  %v1847_v41 = vld [vmem:[%s2254_s6 + $0xc] sm:$0xf0]  ;;  %v1651_v44 = vld [vmem:[#allocation2 + $0x1d0] sm:$0xf0]  ;;  %v2262_v52 = vor.u32 %v1848_v36, %v1417_v35 }
  0x2d   : > { %v1845_v45 = vld [vmem:[%s2254_s6 + $0x4] sm:$0xf]  ;;  %v1411_v46 = vld [vmem:[%s2254_s6 + $0x10] sm:$0xf0]  ;;  %v1529_v51 = vld [vmem:[#allocation2 + $0xc8] sm:$0xf]  ;;  %v2264_v54 = vor.u32 %v1847_v41, %v1409_v40  ;;  %v1654_v59 = vor.u32 %v1905_v39, %v1651_v44 }
  0x2e   : > { %851 = vmatpush.bf16.msra.mxu0 %v1442_v17  ;;  %v1937_v49 = vld [vmem:[#allocation2 + $0x2c4] sm:$0xf]  ;;  %v1779_v50 = vld [vmem:[#allocation2 + $0x2d0] sm:$0xf0]  ;;  %v1876_v53 = vld [vmem:[#allocation2 + $0xd4] sm:$0xf0]  ;;  %v2266_v57 = vor.u32 %v1845_v45, %v1411_v46 }
  0x2f   : > { %865 = vmatpush.bf16.msra.mxu1 %v1570_v21  ;;  %907 = vmatpush.bf16.msra.mxu3 %v1446_v26  ;;  %v1809_v55 = vld [vmem:[#allocation2 + $0x300] sm:$0xf]  ;;  %v1947_v56 = vld [vmem:[#allocation2 + $0x30c] sm:$0xf0]  ;;  %v1901_v60 = vld [vmem:[#allocation2 + $0x1a4] sm:$0xf]  ;;  %v1782_v62 = vor.u32 %v1937_v49, %v1779_v50  ;;  %v1530_v63 = vor.u32 %v1876_v53, %v1529_v51 }
  0x30   : > { %879 = vmatpush.bf16.msra.mxu2 %v1698_v22  ;;  %v1810_v58 = vor.u32 %v1947_v56, %v1809_v55  ;;  %v1635_v61 = vld [vmem:[#allocation2 + $0x1b0] sm:$0xf0]  ;;  %v1933_v0 = vld [vmem:[#allocation2 + $0x2a4] sm:$0xf]  ;;  %v1513_v4 = vld [vmem:[#allocation2 + $0xa8] sm:$0xf] }
  0x31   : > { %v1945_v1 = vld [vmem:[#allocation2 + $0x304] sm:$0xf]  ;;  %v1811_v2 = vld [vmem:[#allocation2 + $0x310] sm:$0xf0]  ;;  %v1872_v5 = vld [vmem:[#allocation2 + $0xb4] sm:$0xf0]  ;;  %v1638_v7 = vor.u32 %v1901_v60, %v1635_v61 }
  0x32   : > { %852 = vmatpush.bf16.msra.mxu0 %v1426_v33  ;;  %v1763_v3 = vld [vmem:[#allocation2 + $0x2b0] sm:$0xf0]  ;;  %v1814_v6 = vor.u32 %v1945_v1, %v1811_v2  ;;  %v1514_v9 = vor.u32 %v1872_v5, %v1513_v4  ;;  %v1897_v10 = vld [vmem:[#allocation2 + $0x184] sm:$0xf]  ;;  %v1497_v14 = vld [vmem:[#allocation2 + $0x88] sm:$0xf] }
  0x33   : > { %866 = vmatpush.bf16.msra.mxu1 %v1554_v37  ;;  %908 = vmatpush.bf16.msra.mxu3 %v1430_v42  ;;  %v1766_v8 = vor.u32 %v1933_v0, %v1763_v3  ;;  %v1619_v11 = vld [vmem:[#allocation2 + $0x190] sm:$0xf0]  ;;  %v1929_v12 = vld [vmem:[#allocation2 + $0x284] sm:$0xf]  ;;  %v1868_v15 = vld [vmem:[#allocation2 + $0x94] sm:$0xf0] }
  0x34   : > { %880 = vmatpush.bf16.msra.mxu2 %v1682_v38  ;;  %v1747_v13 = vld [vmem:[#allocation2 + $0x290] sm:$0xf0]  ;;  %v1622_v16 = vor.u32 %v1897_v10, %v1619_v11  ;;  %v1498_v18 = vor.u32 %v1868_v15, %v1497_v14  ;;  %v1893_v19 = vld [vmem:[#allocation2 + $0x164] sm:$0xf]  ;;  %v1481_v23 = vld [vmem:[#allocation2 + $0x68] sm:$0xf] }
  0x35   : > { %853 = vmatmul.bf16.vlgmr.msra.gmra.mxu0 %v2264_v54  ;;  %v1750_v17 = vor.u32 %v1929_v12, %v1747_v13  ;;  %v1603_v20 = vld [vmem:[#allocation2 + $0x170] sm:$0xf0]  ;;  %v1925_v21 = vld [vmem:[#allocation2 + $0x264] sm:$0xf]  ;;  %v1864_v24 = vld [vmem:[#allocation2 + $0x74] sm:$0xf0] }
  0x36   : > { %915 = vmatpush.bf16.msrb.mxu0 %v1670_v43  ;;  %867 = vmatmul.bf16.vlgmr.msra.gmra.mxu1 %v2266_v57  ;;  %v1731_v22 = vld [vmem:[#allocation2 + $0x270] sm:$0xf0]  ;;  %v1846_v25 = vld [vmem:[%s2254_s6 + $0xc] sm:$0xf]  ;;  %v1419_v26 = vld [vmem:[%s2254_s6 + $0x18] sm:$0xf0]  ;;  %v1606_v27 = vor.u32 %v1893_v19, %v1603_v20  ;;  %v1482_v31 = vor.u32 %v1864_v24, %v1481_v23 }
  0x37   : > { %929 = vmatpush.bf16.msrb.mxu1 %v1798_v47  ;;  %957 = vmatpush.bf16.msrb.mxu3 %v1546_v48  ;;  %v1673_v28 = vld [vmem:[#allocation2 + $0x1e8] sm:$0xf]  ;;  %v1912_v29 = vld [vmem:[#allocation2 + $0x1f4] sm:$0xf0]  ;;  %v1734_v30 = vor.u32 %v1925_v21, %v1731_v22  ;;  %v1889_v32 = vld [vmem:[#allocation2 + $0x144] sm:$0xf]  ;;  %v2274_v35 = vor.u32 %v1846_v25, %v1419_v26 }
  0x38   : > { %881 = vmatmul.bf16.vlgmr.msra.gmra.mxu2 %v2262_v52  ;;  %909 = vmatmul.bf16.vlgmr.msra.gmra.mxu3 %v2264_v54  ;;  %v1587_v33 = vld [vmem:[#allocation2 + $0x150] sm:$0xf0]  ;;  %v1921_v34 = vld [vmem:[#allocation2 + $0x244] sm:$0xf]  ;;  %v1465_v37 = vld [vmem:[#allocation2 + $0x48] sm:$0xf]  ;;  %v1674_v39 = vor.u32 %v1912_v29, %v1673_v28 }
  0x39   : > { %894 = vmatpush.bf16.msrb.mxu2 %v1810_v58  ;;  %v1715_v36 = vld [vmem:[#allocation2 + $0x250] sm:$0xf0]  ;;  %v1860_v38 = vld [vmem:[#allocation2 + $0x54] sm:$0xf0]  ;;  %v1590_v40 = vor.u32 %v1889_v32, %v1587_v33  ;;  %v1657_v41 = vld [vmem:[#allocation2 + $0x1c8] sm:$0xf] }
  0x3a   : > { %916 = vmatpush.bf16.msrb.mxu0 %v1654_v59  ;;  %v1908_v42 = vld [vmem:[#allocation2 + $0x1d4] sm:$0xf0]  ;;  %v1718_v43 = vor.u32 %v1921_v34, %v1715_v36  ;;  %v1466_v44 = vor.u32 %v1860_v38, %v1465_v37  ;;  %v1885_v45 = vld [vmem:[#allocation2 + $0x124] sm:$0xf]  ;;  %v1571_v46 = vld [vmem:[#allocation2 + $0x130] sm:$0xf0] }
  0x3b   : > { %930 = vmatpush.bf16.msrb.mxu1 %v1782_v62  ;;  %958 = vmatpush.bf16.msrb.mxu3 %v1530_v63  ;;  %v1917_v47 = vld [vmem:[#allocation2 + $0x224] sm:$0xf]  ;;  %v1699_v48 = vld [vmem:[#allocation2 + $0x230] sm:$0xf0]  ;;  %v1449_v49 = vld [vmem:[#allocation2 + $0x28] sm:$0xf]  ;;  %v1658_v51 = vor.u32 %v1908_v42, %v1657_v41  ;;  %v1574_v53 = vor.u32 %v1885_v45, %v1571_v46 }
  0x3c   : > { %v1856_v50 = vld [vmem:[#allocation2 + $0x34] sm:$0xf0]  ;;  %v1641_v55 = vld [vmem:[#allocation2 + $0x1a8] sm:$0xf]  ;;  %v1881_v58 = vld [vmem:[#allocation2 + $0x104] sm:$0xf]  ;;  %v1702_v59 = vor.u32 %v1917_v47, %v1699_v48 }
  0x3d   : > { %950 = vmatpush.bf16.msra.mxu2 %v1814_v6  ;;  %v1904_v56 = vld [vmem:[#allocation2 + $0x1b4] sm:$0xf0]  ;;  %v1450_v60 = vor.u32 %v1856_v50, %v1449_v49  ;;  %v1555_v61 = vld [vmem:[#allocation2 + $0x110] sm:$0xf0]  ;;  %v1913_v62 = vld [vmem:[#allocation2 + $0x204] sm:$0xf] }
  0x3e   : > { %917 = vmatpush.bf16.msrb.mxu0 %v1638_v7  ;;  %v1683_v63 = vld [vmem:[#allocation2 + $0x210] sm:$0xf0]  ;;  %v1433_v0 = vld [vmem:[#allocation2 + $0x8] sm:$0xf]  ;;  %v1852_v1 = vld [vmem:[#allocation2 + $0x14] sm:$0xf0]  ;;  %v1642_v3 = vor.u32 %v1904_v56, %v1641_v55  ;;  %v1558_v7 = vor.u32 %v1881_v58, %v1555_v61 }
  0x3f   : > { %931 = vmatpush.bf16.msrb.mxu1 %v1766_v8  ;;  %959 = vmatpush.bf16.msrb.mxu3 %v1514_v9  ;;  %v1801_v2 = vld [vmem:[#allocation2 + $0x2e8] sm:$0xf]  ;;  %v1944_v4 = vld [vmem:[#allocation2 + $0x2f4] sm:$0xf0]  ;;  %v1878_v5 = vld [vmem:[#allocation2 + $0xec] sm:$0xf]  ;;  %v1686_v10 = vor.u32 %v1913_v62, %v1683_v63  ;;  %v1434_v11 = vor.u32 %v1852_v1, %v1433_v0 }
  0x40   : > { %v1547_v6 = vld [vmem:[#allocation2 + $0xf8] sm:$0xf0]  ;;  %v1625_v8 = vld [vmem:[#allocation2 + $0x188] sm:$0xf]  ;;  %v1900_v9 = vld [vmem:[#allocation2 + $0x194] sm:$0xf0]  ;;  %v1802_v12 = vor.u32 %v1944_v4, %v1801_v2 }
  0x41   : > { %v1550_v13 = vor.u32 %v1878_v5, %v1547_v6  ;;  %v1817_v14 = vld [vmem:[#allocation2 + $0x308] sm:$0xf]  ;;  %v1948_v15 = vld [vmem:[#allocation2 + $0x314] sm:$0xf0]  ;;  %v1874_v21 = vld [vmem:[#allocation2 + $0xcc] sm:$0xf] }
  0x42   : > { %918 = vmatpush.bf16.msrb.mxu0 %v1622_v16  ;;  %v1910_v16 = vld [vmem:[#allocation2 + $0x1ec] sm:$0xf]  ;;  %v1785_v19 = vld [vmem:[#allocation2 + $0x2c8] sm:$0xf]  ;;  %v1940_v20 = vld [vmem:[#allocation2 + $0x2d4] sm:$0xf0]  ;;  %v1818_v23 = vor.u32 %v1948_v15, %v1817_v14 }
  0x43   : > { %932 = vmatpush.bf16.msrb.mxu1 %v1750_v17  ;;  %960 = vmatpush.bf16.msrb.mxu3 %v1498_v18  ;;  %v1626_v17 = vor.u32 %v1900_v9, %v1625_v8  ;;  %v1675_v18 = vld [vmem:[#allocation2 + $0x1f8] sm:$0xf0]  ;;  %v1609_v24 = vld [vmem:[#allocation2 + $0x168] sm:$0xf]  ;;  %v1896_v25 = vld [vmem:[#allocation2 + $0x174] sm:$0xf0] }
  0x44   : > { %v1531_v22 = vld [vmem:[#allocation2 + $0xd8] sm:$0xf0]  ;;  %v1678_v26 = vor.u32 %v1910_v16, %v1675_v18  ;;  %v1906_v28 = vld [vmem:[#allocation2 + $0x1cc] sm:$0xf]  ;;  %v1936_v32 = vld [vmem:[#allocation2 + $0x2b4] sm:$0xf0]  ;;  %v1610_v33 = vor.u32 %v1896_v25, %v1609_v24 }
  0x45   : > { %v1534_v29 = vor.u32 %v1874_v21, %v1531_v22  ;;  %v1870_v34 = vld [vmem:[#allocation2 + $0xac] sm:$0xf]  ;;  %v1515_v36 = vld [vmem:[#allocation2 + $0xb8] sm:$0xf0]  ;;  %v1593_v37 = vld [vmem:[#allocation2 + $0x148] sm:$0xf] }
  0x46   : > { %919 = vmatpush.bf16.msrb.mxu0 %v1606_v27  ;;  %v1786_v27 = vor.u32 %v1940_v20, %v1785_v19  ;;  %v1892_v38 = vld [vmem:[#allocation2 + $0x154] sm:$0xf0]  ;;  %v1902_v41 = vld [vmem:[#allocation2 + $0x1ac] sm:$0xf]  ;;  %v1518_v42 = vor.u32 %v1870_v34, %v1515_v36  ;;  %v1499_v48 = vld [vmem:[#allocation2 + $0x98] sm:$0xf0] }
  0x47   : > { %933 = vmatpush.bf16.msrb.mxu1 %v1734_v30  ;;  %961 = vmatpush.bf16.msrb.mxu3 %v1482_v31  ;;  %v1659_v30 = vld [vmem:[#allocation2 + $0x1d8] sm:$0xf0]  ;;  %v1769_v31 = vld [vmem:[#allocation2 + $0x2a8] sm:$0xf]  ;;  %v1932_v45 = vld [vmem:[#allocation2 + $0x294] sm:$0xf0]  ;;  %v1594_v46 = vor.u32 %v1892_v38, %v1593_v37 }
  0x48   : > { %1823 = vmatmul.msk.bf16.vlgmr.msrb.gmra.mxu2 %vm841_vm0, %v2274_v35  ;;  %v1866_v47 = vld [vmem:[#allocation2 + $0x8c] sm:$0xf]  ;;  %v1577_v49 = vld [vmem:[#allocation2 + $0x128] sm:$0xf]  ;;  %v1888_v50 = vld [vmem:[#allocation2 + $0x134] sm:$0xf0] }
  0x49   : > { %971 = vmatpush.bf16.msrb.mxu2 %v1674_v39  ;;  %v1662_v39 = vor.u32 %v1906_v28, %v1659_v30  ;;  %v1898_v55 = vld [vmem:[#allocation2 + $0x18c] sm:$0xf]  ;;  %v1502_v56 = vor.u32 %v1866_v47, %v1499_v48  ;;  %v1627_v58 = vld [vmem:[#allocation2 + $0x198] sm:$0xf0]  ;;  %v1578_v61 = vor.u32 %v1888_v50, %v1577_v49  ;;  %v1561_v0 = vld [vmem:[#allocation2 + $0x108] sm:$0xf] }
  0x4a   : > { %920 = vmatpush.bf16.msrb.mxu0 %v1590_v40  ;;  %v1770_v40 = vor.u32 %v1936_v32, %v1769_v31  ;;  %v1862_v62 = vld [vmem:[#allocation2 + $0x6c] sm:$0xf]  ;;  %v1483_v63 = vld [vmem:[#allocation2 + $0x78] sm:$0xf0]  ;;  %v1884_v1 = vld [vmem:[#allocation2 + $0x114] sm:$0xf0]  ;;  %v1630_v2 = vor.u32 %v1898_v55, %v1627_v58 }
  0x4b   : > { %934 = vmatpush.bf16.msrb.mxu1 %v1718_v43  ;;  %962 = vmatpush.bf16.msrb.mxu3 %v1466_v44  ;;  %v1643_v43 = vld [vmem:[#allocation2 + $0x1b8] sm:$0xf0]  ;;  %v1753_v44 = vld [vmem:[#allocation2 + $0x288] sm:$0xf]  ;;  %v1942_v4 = vld [vmem:[#allocation2 + $0x2ec] sm:$0xf] }
  0x4c   : > { %v1803_v5 = vld [vmem:[#allocation2 + $0x2f8] sm:$0xf0]  ;;  %v1894_v6 = vld [vmem:[#allocation2 + $0x16c] sm:$0xf]  ;;  %v1721_v9 = vld [vmem:[#allocation2 + $0x248] sm:$0xf] }
  0x4d   : > { %972 = vmatpush.bf16.msrb.mxu2 %v1658_v51  ;;  %v1646_v51 = vor.u32 %v1902_v41, %v1643_v43  ;;  %v1611_v8 = vld [vmem:[#allocation2 + $0x178] sm:$0xf0]  ;;  %v1806_v14 = vor.u32 %v1942_v4, %v1803_v5  ;;  %v1890_v19 = vld [vmem:[#allocation2 + $0x14c] sm:$0xf]  ;;  %v1705_v22 = vld [vmem:[#allocation2 + $0x228] sm:$0xf] }
  0x4e   : > { %921 = vmatpush.bf16.msrb.mxu0 %v1574_v53  ;;  %v1754_v53 = vor.u32 %v1932_v45, %v1753_v44  ;;  %v1614_v15 = vor.u32 %v1894_v6, %v1611_v8  ;;  %v1787_v18 = vld [vmem:[#allocation2 + $0x2d8] sm:$0xf0]  ;;  %v1854_v24 = vld [vmem:[#allocation2 + $0x2c] sm:$0xf]  ;;  %v1689_v34 = vld [vmem:[#allocation2 + $0x208] sm:$0xf] }
  0x4f   : > { %935 = vmatpush.bf16.msrb.mxu1 %v1702_v59  ;;  %963 = vmatpush.bf16.msrb.mxu3 %v1450_v60  ;;  %v1737_v59 = vld [vmem:[#allocation2 + $0x268] sm:$0xf]  ;;  %v1928_v60 = vld [vmem:[#allocation2 + $0x274] sm:$0xf0]  ;;  %v1595_v21 = vld [vmem:[#allocation2 + $0x158] sm:$0xf0] }
  0x50   : > { %v1451_v25 = vld [vmem:[#allocation2 + $0x38] sm:$0xf0]  ;;  %v1886_v31 = vld [vmem:[#allocation2 + $0x12c] sm:$0xf]  ;;  %v1916_v36 = vld [vmem:[#allocation2 + $0x214] sm:$0xf0] }
  0x51   : > { %973 = vmatpush.bf16.msrb.mxu2 %v1642_v3  ;;  %v1738_v3 = vor.u32 %v1928_v60, %v1737_v59  ;;  %v1771_v30 = vld [vmem:[#allocation2 + $0x2b8] sm:$0xf0]  ;;  %v1454_v32 = vor.u32 %v1854_v24, %v1451_v25  ;;  %v1850_v37 = vld [vmem:[#allocation2 + $0xc] sm:$0xf]  ;;  %v1690_v41 = vor.u32 %v1916_v36, %v1689_v34  ;;  %v1105_v36 = vld [vmem:[%s2466_s2 + $0xc0] sm:$0xff]  ;;  %s2419_s17 = scalar_lea.vmem [#allocation4], %s1403_s14  }
  0x52   : > { %922 = vmatpush.bf16.msrb.mxu0 %v1558_v7  ;;  %v1486_v7 = vor.u32 %v1862_v62, %v1483_v63  ;;  %v1435_v38 = vld [vmem:[#allocation2 + $0x18] sm:$0xf0]  ;;  %v1882_v45 = vld [vmem:[#allocation2 + $0x10c] sm:$0xf]  ;;  %s1173_s12 = ssub.s32 (%p2227_p4), 3, %s2242_s28  ;;  %s1949_s18 = sshll.u32 (%p2227_p4), %s2215_s15, 4 }
  0x53   : > { %936 = vmatpush.bf16.msrb.mxu1 %v1686_v10  ;;  %964 = vmatpush.bf16.msrb.mxu3 %v1434_v11  ;;  %v1924_v10 = vld [vmem:[#allocation2 + $0x254] sm:$0xf0]  ;;  %v1562_v11 = vor.u32 %v1884_v1, %v1561_v0  ;;  %v1755_v43 = vld [vmem:[#allocation2 + $0x298] sm:$0xf0]  ;;  %v1438_v44 = vor.u32 %v1850_v37, %v1435_v38  ;;  %v1946_v47 = vld [vmem:[#allocation2 + $0x30c] sm:$0xf]  ;;  %s2430_s23 = scalar_lea.vmem (%p2227_p4), %s2467_s3, %s1949_s18  }
  0x54   : > { %v1722_v16 = vor.u32 %v1924_v10, %v1721_v9  ;;  %v1819_v48 = vld [vmem:[#allocation2 + $0x318] sm:$0xf0]  ;;  %v1922_v58 = vld [vmem:[#allocation2 + $0x24c] sm:$0xf]  ;;  %v1089_v9 = vld [vmem:[%s2466_s2 + $0x40] sm:$0xff]  ;;  %p1174_p11 = scmp.lt.s32.totalorder (%p2227_p4), %s1173_s12, 2 }
  0x55   : > { %974 = vmatpush.bf16.msrb.mxu2 %v1626_v17  ;;  %923 = vmatmul.bf16.vlgmr.msrb.gmra.mxu0 %v2266_v57  ;;  %v1938_v17 = vld [vmem:[#allocation2 + $0x2cc] sm:$0xf]  ;;  %v1822_v55 = vor.u32 %v1946_v47, %v1819_v48  ;;  %v1723_v59 = vld [vmem:[#allocation2 + $0x258] sm:$0xf0] }
  0x56   : > { %985 = vmatpush.bf16.msra.mxu0 %v1802_v12  ;;  %937 = vmatmul.bf16.vlgmr.msrb.gmra.mxu1 %v2262_v52  ;;  %v1858_v12 = vld [vmem:[#allocation2 + $0x4c] sm:$0xf]  ;;  %v1726_v60 = vor.u32 %v1922_v58, %v1723_v59  ;;  %v1707_v62 = vld [vmem:[#allocation2 + $0x238] sm:$0xf0]  ;;  %v1097_v58 = vld [vmem:[%s2466_s2 + $0x80] sm:$0xff] }
  0x57   : > { %1013 = vmatpush.bf16.msra.mxu3 %v1550_v13  ;;  %1006 = vmatpush.bf16.msra.mxu1 %v1818_v23  ;;  %v1467_v13 = vld [vmem:[#allocation2 + $0x58] sm:$0xf0]  ;;  %v1920_v23 = vld [vmem:[#allocation2 + $0x234] sm:$0xf0]  ;;  %v1914_v0 = vld [vmem:[#allocation2 + $0x20c] sm:$0xf] }
  0x58   : > { %965 = vmatmul.bf16.vlgmr.msrb.gmra.mxu3 %v2264_v54  ;;  %1824 = vmatmul.msk.bf16.vlgmr.msra.gmra.mxu2 %vm841_vm0, %v2274_v35  ;;  %v1470_v20 = vor.u32 %v1858_v12, %v1467_v13  ;;  %v1706_v28 = vor.u32 %v1920_v23, %v1705_v22  ;;  %v1691_v1 = vld [vmem:[#allocation2 + $0x218] sm:$0xf0]  ;;  %v1094_v4 = vld [vmem:[%s2466_s2 + $0x68] sm:$0xff]  ;;  %v1087_v13 = vld [vmem:[%s2466_s2 + $0x30] sm:$0xff] }
  0x59   : > { %975 = vmatpush.bf16.msrb.mxu2 %v1610_v33  ;;  %v1579_v33 = vld [vmem:[#allocation2 + $0x138] sm:$0xf0]  ;;  %v1090_v8 = vld [vmem:[%s2466_s2 + $0x48] sm:$0xff]  ;;  %v1111_v22 = vld [vmem:[%s2466_s2 + $0xf0] sm:$0xff] }
  0x5a   : > { %986 = vmatpush.bf16.msra.mxu0 %v1786_v27  ;;  %v1598_v27 = vor.u32 %v1890_v19, %v1595_v21  ;;  %v1088_v10 = vld [vmem:[%s2466_s2 + $0x38] sm:$0xff]  ;;  %v1083_v21 = vld [vmem:[%s2466_s2 + $0x10] sm:$0xff]  ;;  %v1082_v24 = vld [vmem:[%s2466_s2 + $0x8] sm:$0xff] }
  0x5b   : > { %1027 = vmatpush.bf16.msrb.mxu1 %v1678_v26  ;;  %1014 = vmatpush.bf16.msra.mxu3 %v1534_v29  ;;  %v1790_v26 = vor.u32 %v1938_v17, %v1787_v18  ;;  %v1934_v29 = vld [vmem:[#allocation2 + $0x2ac] sm:$0xf]  ;;  %v1084_v17 = vld [vmem:[%s2466_s2 + $0x18] sm:$0xff] }
  0x5c   : > { %v1112_v18 = vld [vmem:[%s2466_s2 + $0xf8] sm:$0xff]  ;;  %v1110_v25 = vld [vmem:[%s2466_s2 + $0xe8] sm:$0xff] }
  0x5d   : > { %976 = vmatpush.bf16.msrb.mxu2 %v1594_v46  ;;  %v1563_v46 = vld [vmem:[#allocation2 + $0x118] sm:$0xf0]  ;;  %v1106_v34 = vld [vmem:[%s2466_s2 + $0xc8] sm:$0xff] }
  0x5e   : > { %987 = vmatpush.bf16.msra.mxu0 %v1770_v40  ;;  %v1582_v40 = vor.u32 %v1886_v31, %v1579_v33  ;;  %v1566_v50 = vor.u32 %v1882_v45, %v1563_v46  ;;  %v1104_v37 = vld [vmem:[%s2466_s2 + $0xb8] sm:$0xff] }
  0x5f   : > { %1028 = vmatpush.bf16.msrb.mxu1 %v1662_v39  ;;  %1015 = vmatpush.bf16.msra.mxu3 %v1518_v42  ;;  %v1774_v39 = vor.u32 %v1934_v29, %v1771_v30  ;;  %v1930_v42 = vld [vmem:[#allocation2 + $0x28c] sm:$0xf]  ;;  %v1108_v29 = vld [vmem:[%s2466_s2 + $0xd8] sm:$0xff] }
  0x60   : > { %v1758_v49 = vor.u32 %v1930_v42, %v1755_v43  ;;  %v1102_v42 = vld [vmem:[%s2466_s2 + $0xa8] sm:$0xff]  ;;  %v1100_v46 = vld [vmem:[%s2466_s2 + $0x98] sm:$0xff] }
  0x61   : > { %977 = vmatpush.bf16.msrb.mxu2 %v1578_v61  ;;  %v1918_v61 = vld [vmem:[#allocation2 + $0x22c] sm:$0xf] }
  0x62   : > { %988 = vmatpush.bf16.msra.mxu0 %v1754_v53  ;;  %v1739_v53 = vld [vmem:[#allocation2 + $0x278] sm:$0xf0]  ;;  %v1710_v63 = vor.u32 %v1918_v61, %v1707_v62 }
  0x63   : > { %1029 = vmatpush.bf16.msrb.mxu1 %v1646_v51  ;;  %1016 = vmatpush.bf16.msra.mxu3 %v1502_v56  ;;  %v1926_v51 = vld [vmem:[#allocation2 + $0x26c] sm:$0xf] }
  0x64   : > { %v1742_v56 = vor.u32 %v1926_v51, %v1739_v53  ;;  %v1098_v53 = vld [vmem:[%s2466_s2 + $0x88] sm:$0xff] }
  0x65   : > { %978 = vmatpush.bf16.msrb.mxu2 %v1562_v11 }
  0x66   : > { %989 = vmatpush.bf16.msra.mxu0 %v1738_v3  ;;  %1825 = vmatmul.msk.bf16.vlgmr.msra.gmra.mxu1 %vm841_vm0, %v2274_v35  ;;  %v1095_v3 = vld [vmem:[%s2466_s2 + $0x70] sm:$0xff] }
  0x67   : > { %1030 = vmatpush.bf16.msrb.mxu1 %v1630_v2  ;;  %1017 = vmatpush.bf16.msra.mxu3 %v1486_v7  ;;  %v1694_v2 = vor.u32 %v1914_v0, %v1691_v1  ;;  %v1091_v7 = vld [vmem:[%s2466_s2 + $0x50] sm:$0xff] }
  0x68   : > { %979 = vmatmul.bf16.vlgmr.msrb.gmra.mxu2 %v2266_v57 }
  0x69   : > { %1041 = vmatpush.bf16.msra.mxu2 %v1806_v14 }
  0x6a   : > { %990 = vmatpush.bf16.msra.mxu0 %v1722_v16  ;;  %v1085_v16 = vld [vmem:[%s2466_s2 + $0x20] sm:$0xff] }
  0x6b   : > { %1031 = vmatpush.bf16.msrb.mxu1 %v1614_v15  ;;  %1018 = vmatpush.bf16.msra.mxu3 %v1470_v20  ;;  %v1086_v15 = vld [vmem:[%s2466_s2 + $0x28] sm:$0xff] }
  0x6d   : > { %1042 = vmatpush.bf16.msra.mxu2 %v1790_v26 }
  0x6e   : > { %991 = vmatpush.bf16.msra.mxu0 %v1706_v28  ;;  %v1109_v28 = vld [vmem:[%s2466_s2 + $0xe0] sm:$0xff] }
  0x6f   : > { %1032 = vmatpush.bf16.msrb.mxu1 %v1598_v27  ;;  %1019 = vmatpush.bf16.msra.mxu3 %v1454_v32  ;;  %v1081_v27 = vld [vmem:[%s2466_s2] sm:$0xff]  ;;  %v1107_v32 = vld [vmem:[%s2466_s2 + $0xd0] sm:$0xff] }
  0x71   : > { %1043 = vmatpush.bf16.msra.mxu2 %v1774_v39 }
  0x72   : > { %992 = vmatpush.bf16.msra.mxu0 %v1690_v41  ;;  %v1103_v41 = vld [vmem:[%s2466_s2 + $0xb0] sm:$0xff] }
  0x73   : > { %1033 = vmatpush.bf16.msrb.mxu1 %v1582_v40  ;;  %1020 = vmatpush.bf16.msra.mxu3 %v1438_v44  ;;  %v1101_v44 = vld [vmem:[%s2466_s2 + $0xa0] sm:$0xff] }
  0x75   : > { %1044 = vmatpush.bf16.msra.mxu2 %v1758_v49  ;;  %993 = vmatmul.bf16.vlgmr.msra.gmra.mxu0 %v2262_v52 }
  0x76   : > { %1021 = vmatmul.bf16.vlgmr.msra.gmra.mxu3 %v2264_v54  ;;  %v1096_v54 = vld [vmem:[%s2466_s2 + $0x78] sm:$0xff]  ;;  %1136 = vmatpush.msrb.mxu0 %v1112_v18 }
  0x77   : > { %1034 = vmatpush.bf16.msrb.mxu1 %v1566_v50  ;;  %1113 = vmatpush.msrb.mxu3 %v1096_v54  ;;  %v1099_v50 = vld [vmem:[%s2466_s2 + $0x90] sm:$0xff] }
  0x78   : > { %1137 = vmatpush.msrb.mxu0 %v1111_v22 }
  0x79   : > { %1045 = vmatpush.bf16.msra.mxu2 %v1742_v56  ;;  %1114 = vmatpush.msrb.mxu3 %v1095_v3 }
  0x7a   : > { %1035 = vmatmul.bf16.vlgmr.msrb.gmra.mxu1 %v2266_v57  ;;  %1138 = vmatpush.msrb.mxu0 %v1110_v25 }
  0x7b   : > { %1062 = vmatpush.bf16.msra.mxu1 %v1822_v55  ;;  %1115 = vmatpush.msrb.mxu3 %v1094_v4 }
  0x7c   : > { %1139 = vmatpush.msrb.mxu0 %v1109_v28 }
  0x7d   : > { %1046 = vmatpush.bf16.msra.mxu2 %v1726_v60 }
  0x7e   : > { %1140 = vmatpush.msrb.mxu0 %v1108_v29 }
  0x80   : > { %1141 = vmatpush.msrb.mxu0 %v1107_v32 }
  0x81   : > { %1047 = vmatpush.bf16.msra.mxu2 %v1710_v63 }
  0x82   : > { %1142 = vmatpush.msrb.mxu0 %v1106_v34 }
  0x84   : > { %1143 = vmatpush.msrb.mxu0 %v1105_v36 }
  0x85   : > { %1048 = vmatpush.bf16.msra.mxu2 %v1694_v2 }
  0x86   : > { %1144 = vmatpush.msrb.mxu0 %v1104_v37 }
  0x88   : > { %1049 = vmatmul.bf16.vlgmr.msra.gmra.mxu2 %v2262_v52  ;;  %v1093_v52 = vld [vmem:[%s2466_s2 + $0x60] sm:$0xff]  ;;  %1145 = vmatpush.msrb.mxu0 %v1103_v41 }
  0x89   : > { %1116 = vmatpush.msrb.mxu3 %v1093_v52 }
  0x8a   : > { %1826 = vmatmul.msk.bf16.vlgmr.msra.gmra.mxu1 %vm841_vm0, %v2274_v35  ;;  %v1092_v35 = vld [vmem:[%s2466_s2 + $0x58] sm:$0xff]  ;;  %1146 = vmatpush.msrb.mxu0 %v1102_v42 }
  0x8b   : > { %1117 = vmatpush.msrb.mxu3 %v1092_v35 }
  0x8c   : > { %1147 = vmatpush.msrb.mxu0 %v1101_v44 }
  0x8d   : > { %1118 = vmatpush.msrb.mxu3 %v1091_v7 }
  0x8e   : > { %1148 = vmatpush.msrb.mxu0 %v1100_v46 }
  0x8f   : > { %1119 = vmatpush.msrb.mxu3 %v1090_v8 }
  0x90   : > { %1149 = vmatpush.msrb.mxu0 %v1099_v50 }
  0x91   : > { %1120 = vmatpush.msrb.mxu3 %v1089_v9 }
  0x92   : > { %1150 = vmatpush.msrb.mxu0 %v1098_v53 }
  0x93   : > { %1121 = vmatpush.msrb.mxu3 %v1088_v10 }
  0x94   : > { %1151 = vmatpush.msrb.mxu0 %v1097_v58 }
  0x95   : > { %1122 = vmatpush.msrb.mxu3 %v1087_v13 }
  0x97   : > { %1123 = vmatpush.msrb.mxu3 %v1086_v15 }
  0x99   : > { %1124 = vmatpush.msrb.mxu3 %v1085_v16 }
  0x9b   : > { %1125 = vmatpush.msrb.mxu3 %v1084_v17 }
  0x9d   : > { %1126 = vmatpush.msrb.mxu3 %v1083_v21 }
  0x9f   : > { %1127 = vmatpush.msrb.mxu3 %v1082_v24 }
  0xa1   : > { %1128 = vmatpush.msrb.mxu3 %v1081_v27 }
  0xb2   : > { %v854_v14 = vpop.f32.mrf.mxu0 }
  0xb3   : > { %v2309_v5 = vpop.f32.mrf.mxu1 }
  0xb4   : > { %v869_v47 = vadd.f32 %v2309_v5, %v854_v14 }
  0xba   : > { %v856_v23 = vpop.f32.mrf.mxu0 }
  0xbb   : > { %v2295_v57 = vpop.f32.mrf.mxu2  ;;  %v2325_v11 = vpop.f32.mrf.mxu1 }
  0xbc   : > { %v2360_v26 = vpop.f32.mrf.mxu3  ;;  %v883_v55 = vadd.f32 %v2295_v57, %v869_v47  ;;  %v871_v61 = vadd.f32 %v2325_v11, %v856_v23 }
  0xc3   : > { %v2311_v6 = vpop.f32.mrf.mxu2 }
  0xc4   : > { %v912_v38 = vpop.f32.mrf.mxu3  ;;  %v885_v57 = vadd.f32 %v2311_v6, %v871_v61 }
  0xcb   : > { %v2327_v12 = vpop.f32.mrf.mxu2 }
  0xcc   : > { %v897_v59 = vadd.f32 %v2327_v12, %v883_v55 }
  0xce   : > { %v1069_v1 = vmul.f32 %v897_v59, %v897_v59 }
  0xd2   : > { %v924_v33 = vpop.f32.mrf.mxu0 }
  0xd3   : > { %v2344_v19 = vpop.f32.mrf.mxu1  ;;  %v2346_v20 = vpop.f32.mrf.mxu2  ;;  %v925_v12 = vadd.f32 %v924_v33, %v2360_v26 }
  0xd4   : > { %v899_v35 = vadd.f32 %v2346_v20, %v885_v57 }
  0xd5   : > { %v939_v14 = vadd.f32 %v2344_v19, %v925_v12 }
  0xd6   : > { %v1071_v8 = vmul.f32 %v899_v35, %v899_v35 }
  0xda   : > { %v926_v43 = vpop.f32.mrf.mxu0 }
  0xdb   : > { %v2371_v30 = vpop.f32.mrf.mxu1  ;;  %v2373_v31 = vpop.f32.mrf.mxu2  ;;  %v927_v20 = vadd.f32 %v926_v43, %v912_v38 }
  0xdc   : > { %v966_v45 = vpop.f32.mrf.mxu3  ;;  %v953_v17 = vadd.f32 %v2373_v31, %v939_v14 }
  0xdd   : > { %v941_v25 = vadd.f32 %v2371_v30, %v927_v20 }
  0xde   : > { %v1070_v23 = vmul.f32 %v953_v17, %v953_v17 }
  0xe3   : > { %v1008_v39 = vpop.f32.mrf.mxu1  ;;  %v954_v40 = vpop.f32.mrf.mxu2 }
  0xe4   : > { %v968_v63 = vpop.f32.mrf.mxu3  ;;  %v955_v29 = vadd.f32 %v954_v40, %v941_v25 }
  0xe6   : > { %v1072_v34 = vmul.f32 %v955_v29, %v955_v29 }
  0xeb   : > { %v1010_v48 = vpop.f32.mrf.mxu1  ;;  %v980_v49 = vpop.f32.mrf.mxu2 }
  0xec   : > { %v981_v51 = vadd.f32 %v980_v49, %v966_v45 }
  0xf2   : > { %v994_v56 = vpop.f32.mrf.mxu0 }
  0xf3   : > { %v995_v60 = vadd.f32 %v994_v56, %v981_v51  ;;  %v982_v0 = vpop.f32.mrf.mxu2 }
  0xf4   : > { %v983_v3 = vadd.f32 %v982_v0, %v968_v63 }
  0xf5   : > { %v1009_v62 = vadd.f32 %v1008_v39, %v995_v60 }
  0xf7   : > { %v1073_v2 = vmul.f32 %v1009_v62, %v1009_v62  ;;  %v1036_v54 = vpop.f32.mrf.mxu1 }
  0xf9   : > { %v1077_v4 = vadd.f32 %v1073_v2, %v1069_v1  ;;  %v1022_v13 = vpop.f32.mrf.mxu3 }
  0xfa   : > { %v996_v52 = vpop.f32.mrf.mxu0  ;;  %v1037_v15 = vadd.f32 %v1036_v54, %v1022_v13 }
  0xfb   : > { %v997_v5 = vadd.f32 %v996_v52, %v983_v3  ;;  %1129 = vmatmul.f32.vlgmr.msrb.gmra.mxu3 %v1077_v4 }
  0xfd   : > { %v1011_v7 = vadd.f32 %v1010_v48, %v997_v5 }
  0xff   : > { %v1075_v9 = vmul.f32 %v1011_v7, %v1011_v7  ;;  %v1038_v10 = vpop.f32.mrf.mxu1 }
 0x101   : > { %v1079_v11 = vadd.f32 %v1075_v9, %v1071_v8  ;;  %v1024_v22 = vpop.f32.mrf.mxu3 }
 0x102   : > { %v1039_v27 = vadd.f32 %v1038_v10, %v1024_v22 }
 0x103   : > { %1132 = vmatmul.f32.gmra.mxu3 %v1079_v11 }
 0x107   : > { %v1064_v16 = vpop.f32.mrf.mxu1 }
 0x10b   : > { %v1050_v6 = vpop.f32.mrf.mxu2 }
 0x10c   : > { %v1051_v18 = vadd.f32 %v1050_v6, %v1037_v15 }
 0x10e   : > { %v1065_v21 = vadd.f32 %v1064_v16, %v1051_v18 }
 0x10f   : > { %v1066_v19 = vpop.f32.mrf.mxu1 }
 0x110   : > { %v1074_v24 = vmul.f32 %v1065_v21, %v1065_v21 }
 0x112   : > { %v1078_v28 = vadd.f32 %v1074_v24, %v1070_v23 }
 0x113   : > { %v1052_v26 = vpop.f32.mrf.mxu2 }
 0x114   : > { %v1053_v32 = vadd.f32 %v1052_v26, %v1039_v27  ;;  %1152 = vmatmul.f32.vlgmr.msrb.gmra.mxu0 %v1078_v28 }
 0x116   : > { %v1067_v33 = vadd.f32 %v1066_v19, %v1053_v32 }
 0x118   : > { %v1076_v36 = vmul.f32 %v1067_v33, %v1067_v33 }
 0x11a   : > { %v1080_v31 = vadd.f32 %v1076_v36, %v1072_v34 }
 0x11c   : > { %1155 = vmatmul.f32.gmra.mxu0 %v1080_v31 }
 0x17e   : > { %v1130_v37 = vpop.f32.mrf.mxu3 }
 0x17f   : > { %v1131_v38 = vadd.f32 1e-06, %v1130_v37 }
 0x186   : > { %v1133_v30 = vpop.f32.mrf.mxu3 }
 0x187   : > { %v1134_v42 = vadd.f32 1e-06, %v1133_v30 }
 0x191   : > { %v1153_v39 = vpop.f32.mrf.mxu0 }
 0x192   : > { %v1154_v41 = vadd.f32 %v1153_v39, %v1131_v38 }
 0x194   : > { %2053 = vlog2.f32 %v1154_v41 }
 0x199   : > { %v1156_v43 = vpop.f32.mrf.mxu0 }
 0x19a   : > { %v2054_v44 = vpop.eup %2053  ;;  %v1157_v40 = vadd.f32 %v1156_v43, %v1134_v42 }
 0x19b   : > { %v1160_v45 = vmul.f32 0.6931472, %v2054_v44 }
 0x19c   : > { %2055 = vlog2.f32 %v1157_v40 }
 0x19d   : > { %1163 = vst [vmem:[%s2419_s17] sm:$0xff] %v1160_v45 }
 0x1a1   : > { %1171 = sbr.rel (!%p2227_p4) target bundleno = 461 (0x1cd), region = 40 }
 0x1a2   : > { %v2056_v46 = vpop.eup %2055 }
 0x1a3   : > { %v1162_v47 = vmul.f32 0.6931472, %v2056_v46 }
 0x1a5   : > { %1164 = vst [vmem:[%s2419_s17 + $0x8] sm:$0xff] %v1162_v47 }
 0x1a6   : > { %s2473_s12 = smov (!%p1174_p11, %s1173_s12), 2 }
 0x1a7   : > { %s1829_s24 = sshll.u32 %s2473_s12, 3 }
 0x1a8   : > { %p1832_p12 = scmp.eq.s32.totalorder %s1829_s24, 0 }
 0x1a9   : > { %s2436_s25 = sshrl.u32 (!%p1832_p12), %s2473_s12, 1 }
 0x1aa   : > { %1182 = sbr.rel (%p1832_p12) target bundleno = 461 (0x1cd), region = 44  ;;  %p1833_p13 = scmp.le.s32.totalorder (!%p1832_p12), %s2436_s25, 0 }
 0x1af   : > { %1344 = sbr.rel (%p1833_p13) target bundleno = 444 (0x1bc), region = 121  ;;  %s2147_s15 = smov (!%p1833_p13), %s2430_s23  }
 0x1b0   : > { %s2151_s20 = smov (!%p1833_p13), %s2419_s17   ;;  %s2155_s28 = smov (!%p1833_p13), 0  }
 0x1b1   : > { %s2159_s26 = smov (!%p1833_p13), 0  }
 0x1b4 LB: >> { %v1247_v48 = vld [vmem:[%s2153_s20] sm:$0xff]  ;;  %v1249_v49 = vld [vmem:[%s2153_s20 + $0x8] sm:$0xff]  ;;  %s1251_s27 = sadd.s32 1, %s2157_s28  ;;  %s1241_s26 = sadd.s32 1, %s2161_s26   ;;  %s2161_s26 = sphi %s2159_s26, %s1241_s26   ;;  %s2157_s28 = sphi %s2155_s28, %s2156_s28   ;;  %s2153_s20 = sphi %s2151_s20, %s1256_s20   ;;  %s2149_s15 = sphi %s2147_s15, %s1257_s15  }
 0x1b5   : >> { %1248 = vst [vmem:[%s2149_s15] sm:$0xff] %v1247_v48  ;;  %p1252_p0 = scmp.ge.s32.totalorder %s1251_s27, %s2436_s25  ;;  %p1240_p1 = scmp.ge.s32.totalorder %s1241_s26, %s2436_s25 }
 0x1b6   : >> { %1250 = vst [vmem:[%s2149_s15 + $0x8] sm:$0xff] %v1249_v49 }
 0x1b7   : >> { %s2475_s27 = smov (%p1252_p0, %s1251_s27), 0  ;;  %1243 = sbr.rel (!%p1240_p1) target bundleno = 436 (0x1b4), region = 127 }
 0x1b8   : >> { %s1834_s29 = sshll.u32 %s2475_s27, 4  ;;  %s2156_s28 = smov %s2475_s27  }
 0x1b9   : >> { %s1256_s20 = scalar_lea.vmem %s2419_s17, %s1834_s29 [#allocation4]   ;;  %s1257_s15 = scalar_lea.vmem %s2430_s23, %s1834_s29  }
 0x1bc PF: > { %s2446_s30 = sand.u32 1, %s2473_s12   ;;  %s1950_s4 = sshll.u32 %s2436_s25, 4 }
 0x1bd   : > { %s1262_s5 = scalar_lea.vmem %s2419_s17, %s1950_s4 [#allocation4]   ;;  %s1264_s6 = scalar_lea.vmem %s2430_s23, %s1950_s4  }
 0x1be   : > { %p1839_p2 = scmp.le.s32.totalorder %s2446_s30, 0 }
 0x1bf   : > { %s2163_s7 = smov (!%p1839_p2), %s1264_s6   ;;  %s2167_s8 = smov (!%p1839_p2), %s1262_s5  }
 0x1c0   : > { %1358 = sbr.rel (%p1839_p2) target bundleno = 461 (0x1cd), region = 132  ;;  %s2171_s9 = smov (!%p1839_p2), 0  }
 0x1c1   : > { %s2175_s10 = smov (!%p1839_p2), 0  }
 0x1c5 LB: >> { %v1274_v50 = vld [vmem:[%s2169_s8] sm:$0xff]  ;;  %s1276_s11 = sadd.s32 1, %s2173_s9  ;;  %s1268_s10 = sadd.s32 1, %s2177_s10   ;;  %s2177_s10 = sphi %s2175_s10, %s1268_s10   ;;  %s2173_s9 = sphi %s2171_s9, %s2172_s9   ;;  %s2169_s8 = sphi %s2167_s8, %s1281_s8   ;;  %s2165_s7 = sphi %s2163_s7, %s1282_s7  }
 0x1c6   : >> { %1275 = vst [vmem:[%s2165_s7] sm:$0xff] %v1274_v50  ;;  %p1277_p3 = scmp.ge.s32.totalorder %s1276_s11, %s2446_s30  ;;  %p1267_p4 = scmp.ge.s32.totalorder %s1268_s10, %s2446_s30 }
 0x1c8   : >> { %s2477_s11 = smov (%p1277_p3, %s1276_s11), 0  ;;  %1270 = sbr.rel (!%p1267_p4) target bundleno = 453 (0x1c5), region = 138 }
 0x1c9   : >> { %s1840_s14 = sshll.u32 %s2477_s11, 3  ;;  %s2172_s9 = smov %s2477_s11  }
 0x1ca   : >> { %s1281_s8 = scalar_lea.vmem %s1262_s5, %s1840_s14 [#allocation4]   ;;  %s1282_s7 = scalar_lea.vmem %s1264_s6, %s1840_s14  }
 0x1cd PF: > { %p11_p5 = scmp.ge.s32.totalorder %s2217_s16, 4   ;;  %s2469_s12 = smov %s2141_s13 }
 0x1ce   : > { %s2470_s13 = smov %s2225_s19  ;;  %s2471_s14 = smov %s2217_s16 }
 0x1cf   :  { %13 = sbr.rel (!%p11_p5) target bundleno = 2 (0x2), region = 149 }
 0x1d4   :  { %1298 = vsyncpa [#allocation3], 1 }
 0x1d5   :  { %1300 = vsyncpa [#allocation3 + $0x1], 1 }

</bundles_post_ra>
